<compile_context>
chip_gen: v5e
topology: v5e:2x2
jax: 0.10.0
libtpu: 0.0.40
codegen_flags: <defaults>
</compile_context>

<pallas_src>
import math

import jax
import jax.numpy as jnp
from jax.experimental import pallas as pl
from jax.experimental.pallas import tpu as pltpu


def _affine_kernel(w_ref, b_ref, x_ref, o_ref):
    # w_ref, b_ref: (1,) f32 scalars in SMEM.  x_ref / o_ref: (tr, C) VMEM tile.
    # Memory-bound op -> compute in f32 (VPU has slack), cast once at the store.
    x = x_ref[...].astype(jnp.float32)
    o_ref[...] = (x * w_ref[0] + b_ref[0]).astype(o_ref.dtype)


def _round_up(a, b):
    return -(-a // b) * b


def _pick_layout(total, itemsize):
    """Return (lane_width_or_None, sublane_pack, block_bytes, vmem_limit_or_None)."""
    # Largest lane width in {1024, 512, 256, 128} that divides `total`:
    # lets us present a lane-dense 2-D slab with a free reshape (no pad/slice).
    lane = None
    for cand in (1024, 512, 256, 128):
        if total % cand == 0:
            lane = cand
            break

    # Minimum sublane granularity per dtype: f32 -> 8, bf16 -> 16, int8 -> 32.
    pack = 8 * max(1, 4 // itemsize)

    # Generation-aware per-block byte budget.
    try:
        vmem_cap = getattr(pltpu.get_tpu_info(), "vmem_capacity_bytes", None)
    except Exception:
        vmem_cap = None

    if vmem_cap is not None and vmem_cap <= 96 * 1024 * 1024:
        # v7x-class (64 MiB VMEM, ~3.2 TB/s HBM): bigger blocks amortize the
        # ~0.35 us/step overhead; raise the 32 MiB default scoped limit so the
        # 2x(in+out) double buffers (32 MiB) fit with headroom (<64 MiB phys).
        block_bytes = 8 << 20
        vmem_limit = 44 << 20
    elif vmem_cap is not None:
        # v5e / v6e (128 MiB physical VMEM): 4 MiB blocks; raise the scoped
        # limit so the 16 MiB of double buffers clear v5e's 16 MiB default.
        block_bytes = 4 << 20
        vmem_limit = 48 << 20
    else:
        # Unknown chip: conservative settings known to fit default limits.
        block_bytes = 2 << 20
        vmem_limit = None
    return lane, pack, block_bytes, vmem_limit


def testnet_forward(x, weight, bias):
    """Equivalent of TestNet.forward.

    x:      any shape (last dim = sequence length L)
    weight: Conv1d weight of shape (1, 1, 1)
    bias:   Conv1d bias of shape (1,)
    """
    orig_shape = x.shape
    orig_dtype = x.dtype
    total = math.prod(orig_shape)
    if total == 0:
        return x  # empty input -> empty output

    itemsize = jnp.dtype(orig_dtype).itemsize
    lane, pack, block_bytes, vmem_limit = _pick_layout(total, itemsize)

    x_flat = x.reshape(-1)
    padded = False
    if lane is None:
        # Rare awkward size (total not a multiple of 128): pad the flat array
        # to the next 128-lane boundary.  Costs one extra HBM pass, but every
        # common NN shape takes the zero-copy branch above instead.
        lane = 128
        pad = _round_up(total, lane) - total
        x_flat = jnp.pad(x_flat, (0, pad))
        padded = True

    rows = x_flat.shape[0] // lane
    x2d = x_flat.reshape(rows, lane)

    # Row tile: ~block_bytes per block, rounded to the dtype's sublane pack;
    # ragged last row-block is handled by Pallas masking (no row rounding).
    tr = max(pack, (block_bytes // (lane * itemsize)) // pack * pack)
    tr = min(tr, _round_up(rows, pack))
    grid = pl.cdiv(rows, tr)

    w_s = weight.reshape(1).astype(jnp.float32)
    b_s = bias.reshape(1).astype(jnp.float32)

    cp_kwargs = dict(dimension_semantics=("parallel",))
    if vmem_limit is not None:
        cp_kwargs["vmem_limit_bytes"] = vmem_limit

    out2d = pl.pallas_call(
        _affine_kernel,
        out_shape=jax.ShapeDtypeStruct((rows, lane), orig_dtype),
        grid_spec=pl.GridSpec(
            grid=(grid,),
            in_specs=[
                pl.BlockSpec(memory_space=pltpu.MemorySpace.SMEM),  # w scalar
                pl.BlockSpec(memory_space=pltpu.MemorySpace.SMEM),  # b scalar
                pl.BlockSpec((tr, lane), lambda i: (i, 0)),         # x tile
            ],
            out_specs=pl.BlockSpec((tr, lane), lambda i: (i, 0)),
        ),
        compiler_params=pltpu.CompilerParams(**cp_kwargs),
        cost_estimate=pl.CostEstimate(
            flops=2 * total,
            transcendentals=0,
            bytes_accessed=2 * total * itemsize,
        ),
    )(w_s, b_s, x2d)

    out_flat = out2d.reshape(-1)
    if padded:
        out_flat = out_flat[:total]
    return out_flat.reshape(orig_shape)


if __name__ == "__main__":
    key = jax.random.PRNGKey(0)
    kx, kw, kb = jax.random.split(key, 3)

    # Small shape consistent with the module (arbitrary leading dims, last dim = seq).
    x = jax.random.normal(kx, (2, 4, 16, 16), dtype=jnp.float32)

    # Conv1d(1, 1, 1) parameters: weight (1, 1, 1), bias (1,).
    weight = jax.random.normal(kw, (1, 1, 1), dtype=jnp.float32)
    bias = jax.random.normal(kb, (1,), dtype=jnp.float32)

    y = jax.block_until_ready(testnet_forward(x, weight, bias))

    # Reference in plain JAX: conv1d(1,1,1) == w*x + b elementwise.
    y_ref = x * weight[0, 0, 0] + bias[0]
    assert y.shape == x.shape and y.dtype == x.dtype
    assert jnp.allclose(y, y_ref, atol=1e-6, rtol=1e-6)

    print("KERNEL_OK")
</pallas_src>

<mosaic_0001>
module attributes {stable_mosaic.version = 11 : i64} {
  func.func @_affine_kernel(%arg0: i32, %arg1: memref<1xf32, #tpu.memory_space<smem>>, %arg2: memref<1xf32, #tpu.memory_space<smem>>, %arg3: memref<8x1024xf32, #tpu.memory_space<vmem>>, %arg4: memref<8x1024xf32, #tpu.memory_space<vmem>>) attributes {dimension_semantics = [#tpu.dimension_semantics<parallel>], iteration_bounds = array<i64: 1>, scalar_prefetch = 0 : i64, scratch_operands = 0 : i64, tpu.core_type = #tpu.core_type<tc>, window_params = [{transform_indices = @transform_0, window_bounds = array<i64: 1>}, {transform_indices = @transform_1, window_bounds = array<i64: 1>}, {transform_indices = @transform_2, window_bounds = array<i64: 8, 1024>}, {transform_indices = @transform_3, window_bounds = array<i64: 8, 1024>}]} {
    %c0 = arith.constant 0 : index
    %c0_0 = arith.constant 0 : index
    %0 = vector.load %arg3[%c0, %c0_0] : memref<8x1024xf32, #tpu.memory_space<vmem>>, vector<8x1024xf32>
    %c0_1 = arith.constant 0 : index
    %1 = memref.load %arg1[%c0_1] : memref<1xf32, #tpu.memory_space<smem>>
    %2 = vector.broadcast %1 : f32 to vector<8x1024xf32>
    %3 = arith.mulf %0, %2 : vector<8x1024xf32>
    %c0_2 = arith.constant 0 : index
    %4 = memref.load %arg2[%c0_2] : memref<1xf32, #tpu.memory_space<smem>>
    %5 = vector.broadcast %4 : f32 to vector<8x1024xf32>
    %6 = arith.addf %3, %5 : vector<8x1024xf32>
    %c0_3 = arith.constant 0 : index
    %c0_4 = arith.constant 0 : index
    %7 = vector.load %arg4[%c0_3, %c0_4] : memref<8x1024xf32, #tpu.memory_space<vmem>>, vector<8x1024xf32>
    tpu.vector_store %arg4[%c0_3, %c0_4], %6 {strides = array<i32>} : memref<8x1024xf32, #tpu.memory_space<vmem>>, vector<8x1024xf32>,
    return
  }
  func.func @transform_0(%arg0: i32) -> i32 {
    %c0_i32 = arith.constant 0 : i32
    %c0_i32_0 = arith.constant 0 : i32
    return %c0_i32 : i32
  }
  func.func @transform_1(%arg0: i32) -> i32 {
    %c0_i32 = arith.constant 0 : i32
    %c0_i32_0 = arith.constant 0 : i32
    return %c0_i32 : i32
  }
  func.func @transform_2(%arg0: i32) -> (i32, i32) {
    %c0_i32 = arith.constant 0 : i32
    %c0_i32_0 = arith.constant 0 : i32
    return %arg0, %c0_i32 : i32, i32
  }
  func.func @transform_3(%arg0: i32) -> (i32, i32) {
    %c0_i32 = arith.constant 0 : i32
    %c0_i32_0 = arith.constant 0 : i32
    return %arg0, %c0_i32 : i32, i32
  }
}

</mosaic_0001>

<bundles_post_ra>
// kernel: tpu_custom_call.1
= control target key start
LH: loop header
LB: loop body
LE: loop exit
PB: predicated region body
PF: predicated region fallthrough
CT: control target
= control target key end

     0   :  { %10 = vsyncpa [#allocation5], 0  ;;  %s186_s0 = inlined_call_operand.<no memory space> [shape: f32[1], index: 0, kind: input, shape index: {}]   ;;  %s187_s1 = inlined_call_operand.<no memory space> [shape: f32[1], index: 1, kind: input, shape index: {}]   ;;  %s188_s2 = inlined_call_operand.hbm [shape: f32[2,1024], index: 2, kind: input, shape index: {}]   ;;  %s189_s3 = inlined_call_operand.hbm [shape: f32[2,1024], index: 3, kind: output, shape index: {}]  }
   0x1   :  { %11 = vsyncpa [#allocation6], 0 }
   0x2   :  { %19 = vsyncadd [#allocation5], 768  ;;  %s20_s14 = sshll.u32 %s188_s2, 4  ;;  %s144_s15 = smov [#allocation4]   ;;  %s21_s14 = int_to_ptr.hbm [resolvable:$true] %s20_s14 }
   0x3   :  { %s22_s16 = sshll.u32 %s144_s15, 4  ;;  %s145_s17 = smov 256   ;;  %s23_s16 = int_to_ptr.vmem [resolvable:$true] %s22_s16 }
   0x4   :  { %s146_s18 = smov 16  }
   0x5   :  { %28 = dma.hbm_to_vmem [thread:$0]  %s21_s14, 256, %s23_s16, [#allocation5], %s145_s17, %s145_s17, %s146_s18  }
   0x6   :  { %140 = dma.done.wait [#allocation5], 1024  }
   0x7   :  { %141 = vsyncadd [#allocation5], 4294966272  ;;  %v42_v0 = vstv %s186_s0  ;;  %v33_v1 = vld [vmem:[#allocation4] sm:$0xff]  ;;  %v52_v2 = vstv %s187_s1  ;;  %v34_v3 = vld [vmem:[#allocation4 + $0x8] sm:$0xff] }
   0x8   :  { %v35_v4 = vld [vmem:[#allocation4 + $0x10] sm:$0xff]  ;;  %v43_v5 = vmul.f32 %v42_v0, %v33_v1  ;;  %v44_v6 = vmul.f32 %v42_v0, %v34_v3  ;;  %v36_v8 = vld [vmem:[#allocation4 + $0x18] sm:$0xff]  ;;  %v37_v9 = vld [vmem:[#allocation4 + $0x20] sm:$0xff] }
   0x9   :  { %v45_v7 = vmul.f32 %v42_v0, %v35_v4  ;;  %v38_v10 = vld [vmem:[#allocation4 + $0x28] sm:$0xff]  ;;  %v46_v11 = vmul.f32 %v42_v0, %v36_v8  ;;  %v47_v12 = vmul.f32 %v42_v0, %v37_v9  ;;  %v39_v14 = vld [vmem:[#allocation4 + $0x30] sm:$0xff]  ;;  %v40_v15 = vld [vmem:[#allocation4 + $0x38] sm:$0xff] }
   0xa   :  { %v48_v13 = vmul.f32 %v42_v0, %v38_v10  ;;  %v53_v16 = vadd.f32 %v52_v2, %v43_v5  ;;  %v54_v17 = vadd.f32 %v52_v2, %v44_v6  ;;  %v49_v19 = vmul.f32 %v42_v0, %v39_v14 }
   0xb   :  { %v55_v18 = vadd.f32 %v52_v2, %v45_v7  ;;  %v56_v20 = vadd.f32 %v52_v2, %v46_v11  ;;  %v50_v21 = vmul.f32 %v42_v0, %v40_v15  ;;  %v57_v22 = vadd.f32 %v52_v2, %v47_v12 }
   0xc   :  { %61 = vst [vmem:[#allocation7] sm:$0xff] %v53_v16  ;;  %v58_v23 = vadd.f32 %v52_v2, %v48_v13  ;;  %v59_v24 = vadd.f32 %v52_v2, %v49_v19 }
   0xd   :  { %62 = vst [vmem:[#allocation7 + $0x8] sm:$0xff] %v54_v17  ;;  %v60_v25 = vadd.f32 %v52_v2, %v50_v21 }
   0xe   :  { %63 = vst [vmem:[#allocation7 + $0x10] sm:$0xff] %v55_v18 }
   0xf   :  { %64 = vst [vmem:[#allocation7 + $0x18] sm:$0xff] %v56_v20 }
  0x10   :  { %65 = vst [vmem:[#allocation7 + $0x20] sm:$0xff] %v57_v22 }
  0x11   :  { %66 = vst [vmem:[#allocation7 + $0x28] sm:$0xff] %v58_v23 }
  0x12   :  { %67 = vst [vmem:[#allocation7 + $0x30] sm:$0xff] %v59_v24 }
  0x13   :  { %68 = vst [vmem:[#allocation7 + $0x38] sm:$0xff] %v60_v25 }
  0x14   :  { %72 = vsyncadd [#allocation6], 768  ;;  %s75_s2 = sshll.u32 %s189_s3, 4  ;;  %s147_s23 = smov [#allocation7]   ;;  %s76_s2 = int_to_ptr.hbm [resolvable:$true] %s75_s2 }
  0x15   :  { %s73_s24 = sshll.u32 %s147_s23, 4  ;;  %s74_s24 = int_to_ptr.vmem [resolvable:$true] %s73_s24 }
  0x16   :  { %81 = dma.vmem_to_hbm [thread:$0]  %s74_s24, 256, %s76_s2, [#allocation6], %s145_s17, %s145_s17, %s146_s18  }
  0x17   :  { %142 = dma.done.wait [#allocation6], 1024  }
  0x18   :  { %143 = vsyncadd [#allocation6], 4294966272 }
  0x19   :  { %86 = vsyncpa [#allocation5], 1 }
  0x1a   :  { %87 = vsyncpa [#allocation6], 1 }

</bundles_post_ra>
